<compile_context>
chip_gen: v5e
topology: v5e:2x2
jax: 0.10.0
libtpu: 0.0.40
codegen_flags: <defaults>
</compile_context>

<pallas_src>
import numpy as np
import jax
import jax.numpy as jnp
from jax.experimental import pallas as pl
from jax.experimental.pallas import tpu as pltpu


# ----------------------------------------------------------------------------
# glue: squeeze / unsqueeze (Glow convention, matches naflow's squeeze2d)
# ----------------------------------------------------------------------------
def squeeze2d(x, factor=2):
    B, C, H, W = x.shape
    x = x.reshape(B, C, H // factor, factor, W // factor, factor)
    x = jnp.transpose(x, (0, 1, 3, 5, 2, 4))
    return x.reshape(B, C * factor * factor, H // factor, W // factor)


def unsqueeze2d(x, factor=2):
    B, C, H, W = x.shape
    f2 = factor * factor
    x = x.reshape(B, C // f2, factor, factor, H, W)
    x = jnp.transpose(x, (0, 1, 4, 2, 5, 3))
    return x.reshape(B, C // f2, H * factor, W * factor)


def _round_up(x, m):
    return (x + m - 1) // m * m


def _cdiv(a, b):
    return (a + b - 1) // b


# ----------------------------------------------------------------------------
# Pallas kernel: channel mix over the whole padded grid, NCHW-native
# ----------------------------------------------------------------------------
def _mix_kernel(w_ref, x_ref, o_ref):
    # x_ref: [C_in, TS]  (channels on sublanes, flattened spatial on lanes)
    # w_ref: [C_out, C_in]
    # o    : [C_out, TS] == exact 1x1-conv semantics, pointwise per lane
    o_ref[...] = jnp.dot(
        w_ref[...],
        x_ref[...],
        preferred_element_type=jnp.float32,
        precision=jax.lax.Precision.HIGHEST,
    ).astype(o_ref.dtype)


_TARGET_BLOCK_BYTES = 4 * 1024 * 1024  # ~4 MiB activation per block


def _choose_spatial_tile(S, C, B, itemsize):
    """Pick a 128-multiple lane tile: ~4 MiB per block, >= ~8 grid steps."""
    if S <= 128:
        return S  # full-dim block satisfies the lane constraint for tiny inputs
    max_lanes = max(128, (_TARGET_BLOCK_BYTES // (itemsize * C)) // 128 * 128)
    ts = min(max_lanes, _round_up(S, 128))
    # Keep at least ~8 total grid steps so both v7x TCs get work and the
    # input/output DMA pipeline always has something in flight.
    while ts > 128 and B * _cdiv(S, ts) < 8:
        ts = max(128, (ts // 2) // 128 * 128)
    return ts


def conv1x1_channel_mix_pallas(z, w):
    """Channel mix O[b,:,h,w] = W @ Z[b,:,h,w] over the whole grid.

    z: [B, C, Hp, Wp] (NCHW), w: [C, C].
    """
    B, C, Hp, Wp = z.shape
    S = Hp * Wp
    x = z.reshape(B, C, S)  # free reshape (row-major, contiguous)

    itemsize = jnp.dtype(z.dtype).itemsize
    ts = _choose_spatial_tile(S, C, B, itemsize)
    nt = _cdiv(S, ts)

    y = pl.pallas_call(
        _mix_kernel,
        out_shape=jax.ShapeDtypeStruct((B, C, S), z.dtype),
        grid=(B, nt),
        in_specs=[
            pl.BlockSpec((C, C), lambda b, j: (0, 0)),
            pl.BlockSpec((None, C, ts), lambda b, j: (b, 0, j)),
        ],
        out_specs=pl.BlockSpec((None, C, ts), lambda b, j: (b, 0, j)),
        compiler_params=pltpu.CompilerParams(
            dimension_semantics=("parallel", "parallel"),
            vmem_limit_bytes=32 * 1024 * 1024,
        ),
    )(w, x)
    return y.reshape(B, C, Hp, Wp)


def _conv1x1_dense(z, w):
    # F.conv2d with a 1x1 kernel == channel-mixing einsum (f32 reference).
    return jnp.einsum("bchw,oc->bohw", z, w, precision=jax.lax.Precision.HIGHEST)


def _mix_stacked(zs, ws):
    # Batch several tiny same-shape partitions into one einsum.
    z = jnp.stack(zs)
    w = jnp.stack(ws)
    o = jnp.einsum("pbchw,poc->pbohw", z, w, precision=jax.lax.Precision.HIGHEST)
    return tuple(o[i] for i in range(len(zs)))


# ----------------------------------------------------------------------------
# Module
# ----------------------------------------------------------------------------
def get_indices(num_channels):
    def generate_ind(pat):
        ind = np.tile(pat.reshape(1, 1, 2, 2), (1, num_channels // 4, 1, 1))
        ind = ind.reshape(1, num_channels // 4, 1, 2, 1, 2)
        ind = np.transpose(ind, (0, 1, 3, 5, 2, 4)).reshape(-1)
        return ind

    m = np.ones(num_channels, dtype=bool)
    t = generate_ind(np.array([[0, 0], [1, 1]], dtype=bool))
    b = ~t
    l = generate_ind(np.array([[0, 1], [0, 1]], dtype=bool))
    r = ~l
    return (m, t, b, l, r, t & l, t & r, b & l, b & r)


class InvertibleConv1x1GridAlign:
    def __init__(self, num_channels, seed=0):
        rng = np.random.RandomState(seed)
        w_init = np.linalg.qr(rng.randn(num_channels, num_channels))[0]
        self.weight = jnp.asarray(w_init.astype(np.float32))
        self.inds = get_indices(num_channels)
        # static integer indices (equivalent to boolean masks, ascending order)
        self.idx = [np.nonzero(mask)[0] for mask in self.inds]

    def get_weight(self, shape, reverse):
        h, w = shape[-2:]
        pixels = [(h - 1) * (w - 1), w - 1, w - 1, h - 1, h - 1, 1, 1, 1, 1]
        weights = [self.weight[ix][:, ix] for ix in self.idx]
        dlogdet = sum(
            jnp.linalg.slogdet(wg)[1] * p for wg, p in zip(weights, pixels)
        )
        if reverse:
            # TODO(synk): torch inverts in float64; float64 is unavailable by
            # default on TPU, so the inverse is taken in float32 here.
            weights = [jnp.linalg.inv(wg) for wg in weights]
        return weights, dlogdet

    def _padded_grid(self, x):
        return squeeze2d(
            jnp.pad(
                unsqueeze2d(x, 2),
                ((0, 0), (0, 0), (1, 1), (1, 1)),
                constant_values=-1.0,
            ),
            2,
        )

    def _partition_edges(self, z):
        _, t, b, l, r, tl, tr, bl, br = self.idx
        z_t = z[:, t, 0:1, 1:-1]
        z_b = z[:, b, -1:, 1:-1]
        z_l = z[:, l, 1:-1, 0:1]
        z_r = z[:, r, 1:-1, -1:]
        z_tl = z[:, tl, 0:1, 0:1]
        z_tr = z[:, tr, 0:1, -1:]
        z_bl = z[:, bl, -1:, 0:1]
        z_br = z[:, br, -1:, -1:]
        return z_t, z_b, z_l, z_r, z_tl, z_tr, z_bl, z_br

    def merge_output(self, z_m, z_t, z_b, z_l, z_r, z_tl, z_tr, z_bl, z_br):
        def unsqueeze_line(ze):
            B, C = ze.shape[:2]
            sz = (1, -1) if ze.shape[-2] == 1 else (-1, 1)
            ze = ze.reshape(B, C // 2, 2, -1)
            ze = jnp.transpose(ze, (0, 1, 3, 2))
            return ze.reshape(B, C // 2, *sz)

        z_m = unsqueeze2d(z_m, 2)
        z_t, z_b, z_l, z_r = [unsqueeze_line(zi) for zi in (z_t, z_b, z_l, z_r)]
        z_tt = jnp.concatenate([z_tl, z_t, z_tr], axis=3)
        z_mm = jnp.concatenate([z_l, z_m, z_r], axis=3)
        z_bb = jnp.concatenate([z_bl, z_b, z_br], axis=3)
        return squeeze2d(jnp.concatenate([z_tt, z_mm, z_bb], axis=2), 2)

    def forward(self, x, logdet=None, reverse=False, use_pallas=True):
        weights, dlogdet = self.get_weight(x.shape, reverse)
        w_m, w_t, w_b, w_l, w_r, w_tl, w_tr, w_bl, w_br = weights

        z = self._padded_grid(x)
        z_t, z_b, z_l, z_r, z_tl, z_tr, z_bl, z_br = self._partition_edges(z)

        if use_pallas:
            # Interior: mix the FULL padded grid in one Pallas pass (border
            # rows/cols computed redundantly and dropped below) -> avoids
            # materializing the strided z_m slice.
            z_mixed = conv1x1_channel_mix_pallas(z, w_m)
            o_m = z_mixed[:, :, 1:-1, 1:-1]
            # Tiny edge / corner slabs: batched XLA einsums (a Pallas launch
            # each would be pure overhead).
            o_t, o_b = _mix_stacked([z_t, z_b], [w_t, w_b])
            o_l, o_r = _mix_stacked([z_l, z_r], [w_l, w_r])
            o_tl, o_tr, o_bl, o_br = _mix_stacked(
                [z_tl, z_tr, z_bl, z_br], [w_tl, w_tr, w_bl, w_br]
            )
        else:
            # independent pure-XLA reference path (original per-partition form)
            o_m = _conv1x1_dense(z[:, :, 1:-1, 1:-1], w_m)
            o_t = _conv1x1_dense(z_t, w_t)
            o_b = _conv1x1_dense(z_b, w_b)
            o_l = _conv1x1_dense(z_l, w_l)
            o_r = _conv1x1_dense(z_r, w_r)
            o_tl = _conv1x1_dense(z_tl, w_tl)
            o_tr = _conv1x1_dense(z_tr, w_tr)
            o_bl = _conv1x1_dense(z_bl, w_bl)
            o_br = _conv1x1_dense(z_br, w_br)

        out = self.merge_output(o_m, o_t, o_b, o_l, o_r, o_tl, o_tr, o_bl, o_br)
        if logdet is not None:
            logdet = logdet + dlogdet if not reverse else logdet - dlogdet
        return out, logdet


# ----------------------------------------------------------------------------
if __name__ == "__main__":
    B, C, H, W = 2, 8, 16, 16
    key = jax.random.PRNGKey(0)
    x = jax.random.normal(key, (B, C, H, W), dtype=jnp.float32)
    logdet0 = jnp.zeros((B,), dtype=jnp.float32)

    mod = InvertibleConv1x1GridAlign(C)

    fwd = jax.jit(lambda xx, ld: mod.forward(xx, logdet=ld, reverse=False))
    out, logdet = fwd(x, logdet0)
    out = jax.block_until_ready(out)
    logdet = jax.block_until_ready(logdet)
    assert out.shape == (B, C, H, W) and logdet.shape == (B,)

    # silent self-check against a pure-JAX reference of the same forward
    out_ref, logdet_ref = mod.forward(
        x, logdet=logdet0, reverse=False, use_pallas=False
    )
    np.testing.assert_allclose(
        np.asarray(out), np.asarray(out_ref), rtol=1e-4, atol=1e-4
    )
    np.testing.assert_allclose(
        np.asarray(logdet), np.asarray(logdet_ref), rtol=1e-4, atol=1e-4
    )

    print("KERNEL_OK")
</pallas_src>

<mosaic_0001>
module attributes {stable_mosaic.version = 11 : i64} {
  func.func @_mix_kernel(%arg0: i32, %arg1: i32, %arg2: memref<8x8xf32, #tpu.memory_space<vmem>>, %arg3: memref<1x8x128xf32, #tpu.memory_space<vmem>>, %arg4: memref<1x8x128xf32, #tpu.memory_space<vmem>>) attributes {dimension_semantics = [#tpu.dimension_semantics<parallel>, #tpu.dimension_semantics<parallel>], iteration_bounds = array<i64: 2, 3>, scalar_prefetch = 0 : i64, scratch_operands = 0 : i64, tpu.core_type = #tpu.core_type<tc>, window_params = [{pipeline_mode = #tpu.pipeline_mode<synchronous>, transform_indices = @transform_0, window_bounds = array<i64: 8, 8>}, {transform_indices = @transform_1, window_bounds = array<i64: 1, 8, 128>}, {transform_indices = @transform_2, window_bounds = array<i64: 1, 8, 128>}]} {
    %c0 = arith.constant 0 : index
    %c0_0 = arith.constant 0 : index
    %0 = vector.load %arg2[%c0, %c0_0] : memref<8x8xf32, #tpu.memory_space<vmem>>, vector<8x8xf32>
    %c0_1 = arith.constant 0 : index
    %c0_2 = arith.constant 0 : index
    %c0_3 = arith.constant 0 : index
    %1 = vector.load %arg3[%c0_1, %c0_2, %c0_3] : memref<1x8x128xf32, #tpu.memory_space<vmem>>, vector<1x8x128xf32>
    %2 = vector.shape_cast %1 : vector<1x8x128xf32> to vector<8x128xf32>
    %cst = arith.constant dense<0.000000e+00> : vector<8x128xf32>
    %3 = tpu.matmul %0, %2, %cst {dimension_numbers = #tpu.dot_dimension_numbers<[1], [0], [0], [1], [0, 0, 1, 1], [], []>, precision = #tpu.contract_precision<fp32>} : vector<8x8xf32>, vector<8x128xf32>, vector<8x128xf32> -> vector<8x128xf32>
    %c0_4 = arith.constant 0 : index
    %c0_5 = arith.constant 0 : index
    %c0_6 = arith.constant 0 : index
    %4 = vector.load %arg4[%c0_4, %c0_5, %c0_6] : memref<1x8x128xf32, #tpu.memory_space<vmem>>, vector<1x8x128xf32>
    %5 = vector.shape_cast %4 : vector<1x8x128xf32> to vector<8x128xf32>
    %6 = vector.shape_cast %3 : vector<8x128xf32> to vector<1x8x128xf32>
    tpu.vector_store %arg4[%c0_4, %c0_5, %c0_6], %6 {strides = array<i32>} : memref<1x8x128xf32, #tpu.memory_space<vmem>>, vector<1x8x128xf32>,
    return
  }
  func.func @transform_0(%arg0: i32, %arg1: i32) -> (i32, i32) {
    %c0_i32 = arith.constant 0 : i32
    %c0_i32_0 = arith.constant 0 : i32
    %c0_i32_1 = arith.constant 0 : i32
    return %c0_i32, %c0_i32_0 : i32, i32
  }
  func.func @transform_1(%arg0: i32, %arg1: i32) -> (i32, i32, i32) {
    %c0_i32 = arith.constant 0 : i32
    %c0_i32_0 = arith.constant 0 : i32
    return %arg0, %c0_i32, %arg1 : i32, i32, i32
  }
  func.func @transform_2(%arg0: i32, %arg1: i32) -> (i32, i32, i32) {
    %c0_i32 = arith.constant 0 : i32
    %c0_i32_0 = arith.constant 0 : i32
    return %arg0, %c0_i32, %arg1 : i32, i32, i32
  }
}

</mosaic_0001>

<bundles_post_ra>
// kernel: custom-call.34
= control target key start
LH: loop header
LB: loop body
LE: loop exit
PB: predicated region body
PF: predicated region fallthrough
CT: control target
= control target key end

     0   :  { %5 = vsyncpa [#allocation2], 0  ;;  %s518_s0 = inlined_call_operand.hbm [shape: f32[4,4], index: 0, kind: input, shape index: {}]   ;;  %s519_s1 = inlined_call_operand.vmem [shape: f32[4,4], index: 1, kind: output, shape index: {0}]   ;;  %s520_s2 = inlined_call_operand.hbm [shape: s32[4], index: 2, kind: output, shape index: {1}]   ;;  %s521_s3 = inlined_call_operand.hbm [shape: s32[4], index: 3, kind: output, shape index: {2}]  }
   0x1   :  { %6 = vsyncpa [#allocation3], 0 }
   0x2   :  { %7 = vsyncpa [#allocation10], 0  ;;  %s11_s14 = sshll.u32 %s518_s0, 4  ;;  %s442_s15 = smov [#allocation1]   ;;  %s12_s14 = int_to_ptr.hbm [resolvable:$true] %s11_s14 }
   0x3   :  { %s13_s16 = sshll.u32 %s442_s15, 4  ;;  %s14_s16 = int_to_ptr.vmem [resolvable:$true] %s13_s16 }
   0x4   :  { %16 = dma.hbm_to_vmem [thread:$0]  %s12_s14, 64, %s14_s16, [#allocation2]  }
   0x5   :  { %432 = dma.done.wait [#allocation2], 64  }
   0x6   :  { %433 = vsyncadd [#allocation2], 4294967232  ;;  %v26_v0 = vlaneseq  ;;  %v443_v1 = vmov 0   ;;  %v21_v3 = vld [vmem:[#allocation1] sm:$0xf]  ;;  %s473_s0 = smov 0  }
   0x7   :  { %25 = vst [vmem:[#allocation6] sm:$0x1] %v443_v1 }
   0x8   :  { %v470_v2 = vshrl.u32 %v26_v0, 7  ;;  %22 = vst [vmem:[#allocation0] sm:$0xf] %v21_v3 }
   0xa   :  { %30 = vst [vmem:[#allocation11] sm:$0xff] %v470_v2 }
   0xf   :  { %v23_v4 = vld [vmem:[#allocation0] sm:$0xff] }
  0x10   :  { %24 = vst [vmem:[#allocation4] sm:$0xff] %v23_v4 }
  0x11 LB: > { %vm46_vm0 = vcmp.lt.s32.totalorder %v470_v2, 4  ;;  %v480_v7 = vstv %s440_s0  ;;  %s87_s17 = ssub.s32 128, %s440_s0  ;;  %v93_v38 = vand.u32 127, %v26_v0  ;;  %s99_s18 = scalar_lea.vmem [#allocation4], %s440_s0  ;;  %v96_v41 = vld [vmem:[#allocation6] ss:$0 sm:$0xff]  ;;  %s440_s0 = sphi %s473_s0, %s36_s0  }
  0x12   : > { %vm45_vm1 = vcmp.ge.s32.totalorder %v470_v2, %v480_v7  ;;  %s105_s21 = scalar_lea.vmem [#allocation11], %s440_s0  ;;  %vm125_vm14 = vcmp.gt.s32.totalorder %v470_v2, %v480_v7  ;;  %s36_s0 = sadd.s32 1, %s440_s0  }
  0x13   : > { %vm47_vm3 = vmand %vm45_vm1, %vm46_vm0  ;;  %vm94_vm12 = vcmp.eq.s32.totalorder %v93_v38, %v480_v7  ;;  %v107_v43 = vld [vmem:[%s105_s21] ss:$0 sm:$0xff]  ;;  %p33_p0 = scmp.ge.s32.totalorder %s36_s0, 4  }
  0x14   :  { %s444_s23 = smov (%p33_p0), [#allocation7]   ;;  %s279_s27 = sshll.u32 (%p33_p0), %s520_s2, 4  ;;  %s280_s27 = int_to_ptr.hbm [resolvable:$true] %s279_s27 }
  0x15   :  { %s277_s24 = sshll.u32 (%p33_p0), %s444_s23, 4  ;;  %s445_s30 = smov (%p33_p0), [#allocation9]   ;;  %s278_s24 = int_to_ptr.vmem [resolvable:$true] %s277_s24 }
  0x16   :  { %s288_s4 = sshll.u32 (%p33_p0), %s445_s30, 4  ;;  %s290_s2 = sshll.u32 (%p33_p0), %s521_s3, 4  ;;  %s289_s4 = int_to_ptr.vmem [resolvable:$true] %s288_s4  ;;  %s291_s2 = int_to_ptr.hbm [resolvable:$true] %s290_s2 }
  0x17   : > { %v41_v5 = vld [vmem:[#allocation4] sm:$0xff]  ;;  %v101_v39 = vld [vmem:[%s99_s18] ss:$0 sm:$0xff] }
  0x18   : > { %v42_v6 = vand.u32 2147483647, %v41_v5 }
  0x1a   : > { %vm336_vm2 = vcmp.gt.f32.partialorder %v42_v6, -inf }
  0x1b   : > { %vm49_vm4 = vmand %vm47_vm3, %vm336_vm2 }
  0x1c   : > { %v50_v8 = vsel %vm49_vm4, %v470_v2, %v480_v7  ;;  %v51_v9 = vsel %vm49_vm4, %v42_v6, -inf  ;;  %vm142_vm4 = vmand %vm125_vm14, %vm94_vm12 }
  0x1d   : > { %v52_v10 = vrot.slane %v51_v9, 1  ;;  %v53_v11 = vrot.slane %v50_v8, 1 }
  0x1f   : > { %vm54_vm5 = vcmp.ge.f32.partialorder %v52_v10, %v51_v9  ;;  %v57_v12 = vrot.slane %v52_v10, 1  ;;  %v58_v13 = vrot.slane %v53_v11, 1 }
  0x20   : > { %v55_v14 = vsel %vm54_vm5, %v52_v10, %v51_v9  ;;  %v56_v15 = vsel %vm54_vm5, %v53_v11, %v50_v8  ;;  %vm117_vm5 = vcmp.gt.s32.totalorder %v93_v38, %v480_v7 }
  0x21   : > { %vm59_vm6 = vcmp.ge.f32.partialorder %v57_v12, %v55_v14  ;;  %v62_v16 = vrot.slane %v57_v12, 1  ;;  %v63_v17 = vrot.slane %v58_v13, 1 }
  0x22   : > { %v60_v18 = vsel %vm59_vm6, %v57_v12, %v55_v14  ;;  %v61_v19 = vsel %vm59_vm6, %v58_v13, %v56_v15 }
  0x23   : > { %vm64_vm7 = vcmp.ge.f32.partialorder %v62_v16, %v60_v18  ;;  %v67_v20 = vrot.slane %v62_v16, 1  ;;  %v68_v21 = vrot.slane %v63_v17, 1 }
  0x24   : > { %v65_v22 = vsel %vm64_vm7, %v62_v16, %v60_v18  ;;  %v66_v23 = vsel %vm64_vm7, %v63_v17, %v61_v19 }
  0x25   : > { %vm69_vm8 = vcmp.ge.f32.partialorder %v67_v20, %v65_v22  ;;  %v72_v24 = vrot.slane %v67_v20, 1  ;;  %v73_v25 = vrot.slane %v68_v21, 1 }
  0x26   : > { %v70_v26 = vsel %vm69_vm8, %v67_v20, %v65_v22  ;;  %v71_v27 = vsel %vm69_vm8, %v68_v21, %v66_v23 }
  0x27   : > { %vm74_vm9 = vcmp.ge.f32.partialorder %v72_v24, %v70_v26  ;;  %v77_v28 = vrot.slane %v72_v24, 1  ;;  %v78_v29 = vrot.slane %v73_v25, 1 }
  0x28   : > { %v75_v30 = vsel %vm74_vm9, %v72_v24, %v70_v26  ;;  %v76_v31 = vsel %vm74_vm9, %v73_v25, %v71_v27 }
  0x29   : > { %vm79_vm10 = vcmp.ge.f32.partialorder %v77_v28, %v75_v30  ;;  %v82_v32 = vrot.slane %v77_v28, 1  ;;  %v83_v33 = vrot.slane %v78_v29, 1 }
  0x2a   : > { %v80_v34 = vsel %vm79_vm10, %v77_v28, %v75_v30  ;;  %v81_v35 = vsel %vm79_vm10, %v78_v29, %v76_v31 }
  0x2b   : > { %vm84_vm11 = vcmp.ge.f32.partialorder %v82_v32, %v80_v34 }
  0x2c   : > { %v86_v36 = vsel %vm84_vm11, %v83_v33, %v81_v35 }
  0x2d   : > { %88 = vrot.lane.b32.xlu0 %v86_v36, %s87_s17 }
  0x9f   : > { %v89_v37 = vpop.permute.xlu0 %88 }
  0xa0   : > { %340 = vpush %v89_v37 }
  0xd1   : > { %s341_s19 = spop %340 }
  0xd2   : > { %v95_v40 = vstv %s341_s19  ;;  %s100_s20 = scalar_lea.vmem [#allocation4], %s341_s19  ;;  %s106_s22 = scalar_lea.vmem [#allocation11], %s341_s19 }
  0xd3   : > { %v102_v42 = vld [vmem:[%s100_s20] ss:$0 sm:$0xff]  ;;  %v97_v45 = vsel %vm94_vm12, %v95_v40, %v96_v41 }
  0xd4   : > { %v108_v44 = vld [vmem:[%s106_s22] ss:$0 sm:$0xff]  ;;  %103 = vst [vmem:[%s100_s20] sm:$0x1] %v101_v39  ;;  %vm111_vm13 = vcmp.ne.f32.partialorder %v102_v42, 0.0  ;;  %v118_v61 = vsel %vm117_vm5, %v102_v42, 0.0 }
  0xd5   : > { %104 = vst [vmem:[%s99_s18] sm:$0x1] %v102_v42  ;;  %vm112_vm15 = vmand %vm94_vm12, %vm111_vm13 }
  0xd6   : > { %109 = vst [vmem:[%s106_s22] sm:$0x1] %v107_v43  ;;  %v113_v46 = vsel %vm112_vm15, %v102_v42, 1.0 }
  0xd7   : > { %110 = vst [vmem:[%s105_s21] sm:$0x1] %v108_v44  ;;  %v126_v47 = vsel %vm125_vm14, %v113_v46, 1.0 }
  0xd8   : > { %354 = vrcp.f32 %v126_v47  ;;  %98 = vst [vmem:[#allocation6] sm:$0x1] %v97_v45  ;;  %v138_v51 = vand.u32 2147483648, %v126_v47  ;;  %v136_v53 = vand.u32 2147483647, %v126_v47  ;;  %vm132_vm1 = vweird.f32 %v126_v47 }
  0xda   : > { %v139_v55 = vor.u32 1.1754944e-38, %v138_v51  ;;  %vm137_vm3 = vcmp.eq.f32.partialorder %v136_v53, 8.507059e+37 }
  0xdc   : > { %v122_v57 = vld [vmem:[#allocation4] sm:$0xff] }
  0xde   : > { %v355_v48 = vpop.eup %354  ;;  %v149_v3 = vld [vmem:[#allocation11] sm:$0xff] (%p33_p0) }
  0xdf   : > { %v128_v49 = vmul.f32 %v355_v48, %v126_v47  ;;  %vm133_vm0 = vweird.f32 %v355_v48  ;;  %v206_v5 = vld [vmem:[#allocation6] sm:$0x1] (%p33_p0) }
  0xe0   : > { %vm134_vm2 = vmor %vm132_vm1, %vm133_vm0  ;;  %209 = vst [vmem:[#allocation7] sm:$0x1] (%p33_p0), %v206_v5 }
  0xe1   : > { %v129_v50 = vsub.f32 1.0, %v128_v49  ;;  %282 = dma.vmem_to_hbm [thread:$0]  (%p33_p0), %s278_s24, 16, %s280_s27, [#allocation3]  }
  0xe3   : > { %v130_v52 = vmul.f32 %v355_v48, %v129_v50 }
  0xe5   : > { %v131_v54 = vadd.f32 %v355_v48, %v130_v52 }
  0xe7   : > { %v135_v56 = vsel %vm134_vm2, %v355_v48, %v131_v54 }
  0xe8   : > { %v140_v58 = vsel %vm137_vm3, %v139_v55, %v135_v56 }
  0xe9   : > { %v141_v59 = vmul.f32 %v140_v58, %v122_v57 }
  0xeb   : > { %v143_v60 = vsel %vm142_vm4, %v141_v59, 0.0 }
  0xec   : > { %144 = vadd.xlane.f32.xlu0 %v143_v60 }
 0x115   :  { %165 = vxpose.xlu0.b32.start.end [1/1] (short) (narrow) (%p33_p0), %v149_v3, 8 }
 0x15f   : > { %v145_v62 = vpop.xlane.xlu0 %144 }
 0x160   : > { %v146_v63 = vmul.f32 %v145_v62, %v118_v61  ;;  %35 = sbr.rel (!%p33_p0) target bundleno = 17 (0x11), region = 83 }
 0x162   : > { %v147_v1 = vsub.f32 %v141_v59, %v146_v63 }
 0x164   : > { %148 = vst [vmem:[#allocation4] sm:$0xff] %v147_v1 }
 0x16b   :  { %v200_v4 = vld [vmem:[#allocation4] sm:$0xf] }
 0x16c   :  { %203 = vst [vmem:[#allocation5] sm:$0xf] %v200_v4 }
 0x173   :  { %v270_v6 = vld [vmem:[#allocation5] sm:$0xf] }
 0x174   :  { %271 = vst [vmem:[%s519_s1] sm:$0xf] %v270_v6 }
 0x1b9   :  { %v181_v0 = vpop.trf.xlu0 }
 0x1ba   :  { %197 = vst [vmem:[#allocation8] sm:$0x1] %v181_v0 }
 0x1c1   :  { %v212_v2 = vld [vmem:[#allocation8] sm:$0x1] }
 0x1c2   :  { %215 = vst [vmem:[#allocation9] sm:$0x1] %v212_v2 }
 0x1c3   :  { %293 = dma.vmem_to_hbm [thread:$0]  %s289_s4, 16, %s291_s2, [#allocation10]  }
 0x1c4   :  { %434 = dma.done.wait [#allocation3], 16  }
 0x1c5   :  { %435 = vsyncadd [#allocation3], 4294967280 }
 0x1c6   :  { %436 = dma.done.wait [#allocation10], 16  }
 0x1c7   :  { %437 = vsyncadd [#allocation10], 4294967280 }
 0x1c8   :  { %302 = vsyncpa [#allocation2], 1 }
 0x1c9   :  { %303 = vsyncpa [#allocation3], 1 }
 0x1ca   :  { %304 = vsyncpa [#allocation10], 1 }

// kernel: custom-call.4
= control target key start
LH: loop header
LB: loop body
LE: loop exit
PB: predicated region body
PF: predicated region fallthrough
CT: control target
= control target key end

     0   :  { %5 = vsyncpa [#allocation4], 0  ;;  %s739_s0 = inlined_call_operand.vmem [shape: f32[8,8], index: 0, kind: input, shape index: {}]   ;;  %s740_s1 = inlined_call_operand.vmem [shape: f32[8,8], index: 1, kind: output, shape index: {0}]   ;;  %s741_s2 = inlined_call_operand.hbm [shape: s32[8], index: 2, kind: output, shape index: {1}]   ;;  %s742_s3 = inlined_call_operand.hbm [shape: s32[8], index: 3, kind: output, shape index: {2}]  }
   0x1   :  { %6 = vsyncpa [#allocation7], 0  ;;  %s642_s12 = smov [#allocation0]   ;;  %s646_s15 = smov %s739_s0  }
   0x2 LB: > { %v50_v0 = vld [vmem:[%s648_s15] sm:$0xff]  ;;  %s52_s15 = scalar_lea.vmem %s648_s15, 8   ;;  %s648_s15 = sphi %s646_s15, %s52_s15   ;;  %s644_s12 = sphi %s642_s12, %s53_s12  }
   0x3   : > { %51 = vst [vmem:[%s644_s12] sm:$0xff] %v50_v0  ;;  %s53_s12 = scalar_lea.vmem %s644_s12, 8   ;;  %p47_p0 = scmp.gt.s32.totalorder %s52_s15, %s739_s0 }
   0x4   :  { %v66_v2 = vlaneseq (%p47_p0)  ;;  %v662_v3 = vmov (%p47_p0), 0   ;;  %s695_s18 = smov (%p47_p0), 0  }
   0x5   :  { %49 = sbr.rel (!%p47_p0) target bundleno = 2 (0x2), region = 123  ;;  %65 = vst [vmem:[#allocation2] sm:$0x1] (%p47_p0), %v662_v3 }
   0x6   :  { %v692_v4 = vshrl.u32 (%p47_p0), %v66_v2, 7 }
   0x8   :  { %70 = vst [vmem:[#allocation8] sm:$0xff] (%p47_p0), %v692_v4 }
   0xa   :  { %v63_v1 = vld [vmem:[#allocation0] sm:$0xff] }
   0xb   :  { %64 = vst [vmem:[#allocation1] sm:$0xff] %v63_v1 }
   0xc LB: > { %v701_v7 = vstv %s652_s18  ;;  %s127_s0 = ssub.s32 128, %s652_s18  ;;  %v133_v38 = vand.u32 127, %v66_v2  ;;  %s139_s19 = scalar_lea.vmem [#allocation1], %s652_s18  ;;  %v136_v41 = vld [vmem:[#allocation2] ss:$0 sm:$0xff]  ;;  %s652_s18 = sphi %s695_s18, %s76_s18  }
   0xd   : > { %vm85_vm0 = vcmp.ge.s32.totalorder %v692_v4, %v701_v7  ;;  %s145_s22 = scalar_lea.vmem [#allocation8], %s652_s18  ;;  %vm165_vm12 = vcmp.gt.s32.totalorder %v692_v4, %v701_v7  ;;  %s76_s18 = sadd.s32 1, %s652_s18  }
   0xe   : > { %vm134_vm10 = vcmp.eq.s32.totalorder %v133_v38, %v701_v7  ;;  %p73_p1 = scmp.ge.s32.totalorder %s76_s18, 8  }
   0xf   : > { %v147_v43 = vld [vmem:[%s145_s22] ss:$0 sm:$0xff]  ;;  %s654_s26 = smov (%p73_p1), %s740_s1   ;;  %s658_s27 = smov (%p73_p1), [#allocation1]  }
  0x12   : > { %v81_v5 = vld [vmem:[#allocation1] sm:$0xff]  ;;  %v141_v39 = vld [vmem:[%s139_s19] ss:$0 sm:$0xff] }
  0x13   : > { %v82_v6 = vand.u32 2147483647, %v81_v5 }
  0x15   : > { %vm397_vm1 = vcmp.gt.f32.partialorder %v82_v6, -inf }
  0x16   : > { %vm89_vm2 = vmand %vm85_vm0, %vm397_vm1 }
  0x17   : > { %v90_v8 = vsel %vm89_vm2, %v692_v4, %v701_v7  ;;  %v91_v9 = vsel %vm89_vm2, %v82_v6, -inf  ;;  %vm182_vm2 = vmand %vm165_vm12, %vm134_vm10 }
  0x18   : > { %v92_v10 = vrot.slane %v91_v9, 1  ;;  %v93_v11 = vrot.slane %v90_v8, 1 }
  0x1a   : > { %vm94_vm3 = vcmp.ge.f32.partialorder %v92_v10, %v91_v9  ;;  %v97_v12 = vrot.slane %v92_v10, 1  ;;  %v98_v13 = vrot.slane %v93_v11, 1 }
  0x1b   : > { %v95_v14 = vsel %vm94_vm3, %v92_v10, %v91_v9  ;;  %v96_v15 = vsel %vm94_vm3, %v93_v11, %v90_v8  ;;  %vm157_vm3 = vcmp.gt.s32.totalorder %v133_v38, %v701_v7 }
  0x1c   : > { %vm99_vm4 = vcmp.ge.f32.partialorder %v97_v12, %v95_v14  ;;  %v102_v16 = vrot.slane %v97_v12, 1  ;;  %v103_v17 = vrot.slane %v98_v13, 1 }
  0x1d   : > { %v100_v18 = vsel %vm99_vm4, %v97_v12, %v95_v14  ;;  %v101_v19 = vsel %vm99_vm4, %v98_v13, %v96_v15 }
  0x1e   : > { %vm104_vm5 = vcmp.ge.f32.partialorder %v102_v16, %v100_v18  ;;  %v107_v20 = vrot.slane %v102_v16, 1  ;;  %v108_v21 = vrot.slane %v103_v17, 1 }
  0x1f   : > { %v105_v22 = vsel %vm104_vm5, %v102_v16, %v100_v18  ;;  %v106_v23 = vsel %vm104_vm5, %v103_v17, %v101_v19 }
  0x20   : > { %vm109_vm6 = vcmp.ge.f32.partialorder %v107_v20, %v105_v22  ;;  %v112_v24 = vrot.slane %v107_v20, 1  ;;  %v113_v25 = vrot.slane %v108_v21, 1 }
  0x21   : > { %v110_v26 = vsel %vm109_vm6, %v107_v20, %v105_v22  ;;  %v111_v27 = vsel %vm109_vm6, %v108_v21, %v106_v23 }
  0x22   : > { %vm114_vm7 = vcmp.ge.f32.partialorder %v112_v24, %v110_v26  ;;  %v117_v28 = vrot.slane %v112_v24, 1  ;;  %v118_v29 = vrot.slane %v113_v25, 1 }
  0x23   : > { %v115_v30 = vsel %vm114_vm7, %v112_v24, %v110_v26  ;;  %v116_v31 = vsel %vm114_vm7, %v113_v25, %v111_v27 }
  0x24   : > { %vm119_vm8 = vcmp.ge.f32.partialorder %v117_v28, %v115_v30  ;;  %v122_v32 = vrot.slane %v117_v28, 1  ;;  %v123_v33 = vrot.slane %v118_v29, 1 }
  0x25   : > { %v120_v34 = vsel %vm119_vm8, %v117_v28, %v115_v30  ;;  %v121_v35 = vsel %vm119_vm8, %v118_v29, %v116_v31 }
  0x26   : > { %vm124_vm9 = vcmp.ge.f32.partialorder %v122_v32, %v120_v34 }
  0x27   : > { %v126_v36 = vsel %vm124_vm9, %v123_v33, %v121_v35 }
  0x28   : > { %128 = vrot.lane.b32.xlu0 %v126_v36, %s127_s0 }
  0x9a   : > { %v129_v37 = vpop.permute.xlu0 %128 }
  0x9b   : > { %402 = vpush %v129_v37 }
  0xcc   : > { %s403_s20 = spop %402 }
  0xcd   : > { %v135_v40 = vstv %s403_s20  ;;  %s140_s21 = scalar_lea.vmem [#allocation1], %s403_s20  ;;  %s146_s23 = scalar_lea.vmem [#allocation8], %s403_s20 }
  0xce   : > { %v142_v42 = vld [vmem:[%s140_s21] ss:$0 sm:$0xff]  ;;  %v137_v45 = vsel %vm134_vm10, %v135_v40, %v136_v41 }
  0xcf   : > { %v148_v44 = vld [vmem:[%s146_s23] ss:$0 sm:$0xff]  ;;  %143 = vst [vmem:[%s140_s21] sm:$0x1] %v141_v39  ;;  %vm151_vm11 = vcmp.ne.f32.partialorder %v142_v42, 0.0  ;;  %v158_v61 = vsel %vm157_vm3, %v142_v42, 0.0 }
  0xd0   : > { %144 = vst [vmem:[%s139_s19] sm:$0x1] %v142_v42  ;;  %vm152_vm13 = vmand %vm134_vm10, %vm151_vm11 }
  0xd1   : > { %149 = vst [vmem:[%s146_s23] sm:$0x1] %v147_v43  ;;  %v153_v46 = vsel %vm152_vm13, %v142_v42, 1.0 }
  0xd2   : > { %150 = vst [vmem:[%s145_s22] sm:$0x1] %v148_v44  ;;  %v166_v47 = vsel %vm165_vm12, %v153_v46, 1.0 }
  0xd3   : > { %528 = vrcp.f32 %v166_v47  ;;  %138 = vst [vmem:[#allocation2] sm:$0x1] %v137_v45  ;;  %v178_v51 = vand.u32 2147483648, %v166_v47  ;;  %v176_v53 = vand.u32 2147483647, %v166_v47  ;;  %vm172_vm15 = vweird.f32 %v166_v47 }
  0xd5   : > { %v179_v55 = vor.u32 1.1754944e-38, %v178_v51  ;;  %vm177_vm1 = vcmp.eq.f32.partialorder %v176_v53, 8.507059e+37 }
  0xd7   : > { %v162_v57 = vld [vmem:[#allocation1] sm:$0xff] }
  0xd9   : > { %v529_v48 = vpop.eup %528  ;;  %v189_v1 = vld [vmem:[#allocation8] sm:$0xff] (%p73_p1) }
  0xda   : > { %v168_v49 = vmul.f32 %v529_v48, %v166_v47  ;;  %vm173_vm14 = vweird.f32 %v529_v48  ;;  %v240_v3 = vld [vmem:[#allocation2] sm:$0x1] (%p73_p1) }
  0xdb   : > { %vm174_vm0 = vmor %vm172_vm15, %vm173_vm14  ;;  %243 = vst [vmem:[#allocation3] sm:$0x1] (%p73_p1), %v240_v3 }
  0xdc   : > { %v169_v50 = vsub.f32 1.0, %v168_v49 }
  0xde   : > { %v170_v52 = vmul.f32 %v529_v48, %v169_v50 }
  0xe0   : > { %v171_v54 = vadd.f32 %v529_v48, %v170_v52 }
  0xe2   : > { %v175_v56 = vsel %vm174_vm0, %v529_v48, %v171_v54 }
  0xe3   : > { %v180_v58 = vsel %vm177_vm1, %v179_v55, %v175_v56 }
  0xe4   : > { %v181_v59 = vmul.f32 %v180_v58, %v162_v57 }
  0xe6   : > { %v183_v60 = vsel %vm182_vm2, %v181_v59, 0.0 }
  0xe7   : > { %184 = vadd.xlane.f32.xlu0 %v183_v60 }
 0x110   :  { %205 = vxpose.xlu0.b32.start.end [1/1] (short) (narrow) (%p73_p1), %v189_v1, 8 }
 0x15a   : > { %v185_v62 = vpop.xlane.xlu0 %184 }
 0x15b   : > { %v186_v63 = vmul.f32 %v185_v62, %v158_v61  ;;  %75 = sbr.rel (!%p73_p1) target bundleno = 12 (0xc), region = 134 }
 0x15d   : > { %v187_v0 = vsub.f32 %v181_v59, %v186_v63 }
 0x15f   : > { %188 = vst [vmem:[#allocation1] sm:$0xff] %v187_v0 }
 0x1b4   :  { %v221_v5 = vpop.trf.xlu0 }
 0x1b5   :  { %237 = vst [vmem:[#allocation5] sm:$0x1] %v221_v5 }
 0x1bc   :  { %v246_v6 = vld [vmem:[#allocation5] sm:$0x1] }
 0x1bd   :  { %249 = vst [vmem:[#allocation6] sm:$0x1] %v246_v6 }
 0x1be LB: > { %v293_v7 = vld [vmem:[%s660_s27] sm:$0xff]  ;;  %s295_s27 = scalar_lea.vmem %s660_s27, 8   ;;  %s660_s27 = sphi %s658_s27, %s295_s27   ;;  %s656_s26 = sphi %s654_s26, %s296_s26  }
 0x1bf   : > { %294 = vst [vmem:[%s656_s26] sm:$0xff] %v293_v7  ;;  %s296_s26 = scalar_lea.vmem %s656_s26, 8   ;;  %p290_p2 = scmp.gt.s32.totalorder %s295_s27, [#allocation1] }
 0x1c0   :  { %s313_s30 = sshll.u32 (%p290_p2), %s741_s2, 4  ;;  %s663_s4 = smov (%p290_p2), [#allocation3]   ;;  %s314_s30 = int_to_ptr.hbm [resolvable:$true] %s313_s30 }
 0x1c1   :  { %292 = sbr.rel (!%p290_p2) target bundleno = 446 (0x1be), region = 156  ;;  %s311_s5 = sshll.u32 (%p290_p2), %s663_s4, 4  ;;  %s312_s5 = int_to_ptr.vmem [resolvable:$true] %s311_s5 }
 0x1c2   :  { %316 = dma.vmem_to_hbm [thread:$0]  (%p290_p2), %s312_s5, 16, %s314_s30, [#allocation4]  }
 0x1c3   :  { %s664_s1 = smov (%p290_p2), [#allocation6]   ;;  %s324_s9 = sshll.u32 (%p290_p2), %s742_s3, 4  ;;  %s325_s9 = int_to_ptr.hbm [resolvable:$true] %s324_s9 }
 0x1c4   :  { %s322_s6 = sshll.u32 (%p290_p2), %s664_s1, 4  ;;  %s323_s6 = int_to_ptr.vmem [resolvable:$true] %s322_s6 }
 0x1c5   :  { %327 = dma.vmem_to_hbm [thread:$0]  (%p290_p2), %s323_s6, 16, %s325_s9, [#allocation7]  }
 0x1c6   :  { %638 = dma.done.wait [#allocation4], 16  }
 0x1c7   :  { %639 = vsyncadd [#allocation4], 4294967280 }
 0x1c8   :  { %640 = dma.done.wait [#allocation7], 16  }
 0x1c9   :  { %641 = vsyncadd [#allocation7], 4294967280 }
 0x1ca   :  { %336 = vsyncpa [#allocation4], 1 }
 0x1cb   :  { %337 = vsyncpa [#allocation7], 1 }

// kernel: _lambda_.1
= control target key start
LH: loop header
LB: loop body
LE: loop exit
PB: predicated region body
PF: predicated region fallthrough
CT: control target
= control target key end

     0   :  { %s519_s9 = smov 0   ;;  %s521_s10 = smov 0   ;;  %s580_s0 = inlined_call_operand.vmem [shape: f32[8,8], index: 0, kind: input, shape index: {}]   ;;  %s581_s1 = inlined_call_operand.vmem [shape: f32[2,8,289], index: 1, kind: input, shape index: {}]   ;;  %s582_s2 = inlined_call_operand.vmem [shape: f32[2,8,289], index: 2, kind: output, shape index: {}]  }
   0x1   :  { %s523_s11 = smov 0   ;;  %s525_s12 = smov 0  }
   0x2   :  { %s527_s13 = smov 0  }
   0x3 LB: > { %s21_s14 = sadd.s32 1, %s494_s11  ;;  %s24_s15 = sadd.s32 1, %s498_s12  ;;  %s502_s13 = sphi %s527_s13, %s12_s13   ;;  %s498_s12 = sphi %s525_s12, %s586_s12   ;;  %s494_s11 = sphi %s523_s11, %s585_s11   ;;  %s490_s10 = sphi %s521_s10, %s584_s10   ;;  %s486_s9 = sphi %s519_s9, %s583_s9  }
   0x4   : > { %p22_p0 = scmp.ge.s32.totalorder %s21_s14, 3  ;;  %p418_p1 = scmp.ge.s32.totalorder %s502_s13, 1 }
   0x5   : > { %p131_p2 = scmp.lt.s32.totalorder %s502_s13, 7 }
   0x6   : > { %s588_s14 = smov (%p22_p0, %s21_s14), 0  ;;  %s590_s15 = smov (!%p22_p0, %s24_s15), %s498_s12 }
   0x7   : > { %p132_p3 = pnand %p418_p1, %p131_p2  ;;  %p26_p4 = scmp.ge.s32.totalorder %s590_s15, 2 }
   0x8   : > { %p159_p5 = scmp.lt.s32.totalorder (!%p132_p3), %s490_s10, 1  ;;  %p161_p6 = scmp.lt.s32.totalorder (!%p132_p3), %s486_s9, 2 }
   0x9   : > { %s592_s15 = smov (%p26_p4, %s590_s15), 0  ;;  %135 = sbr.rel (%p132_p3) target bundleno = 169 (0xa9), region = 28 }
   0xe   : > { %v175_v0 = vld [vmem:[%s580_s0] sm:$0xff]  ;;  %vm177_vm0 = vcmask 64512   ;;  %s594_s10 = smov (!%p159_p5, %s490_s10), 1  ;;  %s596_s9 = smov (!%p161_p6, %s486_s9), 2 }
   0xf   : > { %v179_v1 = vsel %vm177_vm0, %v175_v0, 0  ;;  %s423_s18 = smul.u32 3, %s594_s10 }
  0x10   : > { %v198_v2 = vand.u32 4294901760, %v179_v1 }
  0x11   : > { %s552_s19 = sadd.s32 %s423_s18, %s596_s9 }
  0x12   : > { %v199_v3 = vsub.f32 %v179_v1, %v198_v2  ;;  %s419_s20 = sshll.u32 %s552_s19, 3 }
  0x13   : > { %s166_s23 = scalar_lea.vmem %s581_s1, %s419_s20  ;;  %s174_s26 = scalar_lea.vmem %s582_s2, %s419_s20 }
  0x14   : > { %v200_v4 = vand.u32 4294901760, %v199_v3  ;;  %v176_v6 = vld [vmem:[%s166_s23] sm:$0xff] }
  0x15   : > { %v196_v7 = vand.u32 4294901760, %v176_v6 }
  0x16   : > { %v201_v5 = vsub.f32 %v199_v3, %v200_v4 }
  0x17   : > { %v223_v9 = vsub.f32 %v176_v6, %v196_v7  ;;  %197 = vmatpush.msra.mxu0 %v196_v7  ;;  %273 = vmatpush.msra.mxu3 %v196_v7 }
  0x18   : > { %v202_v8 = vand.u32 4294901760, %v201_v5  ;;  %277 = vmatmul.f32.vlgmr.msra.gmra.mxu3 %v200_v4 }
  0x19   : > { %250 = vmatpush.msra.mxu2 %v223_v9  ;;  %v224_v10 = vand.u32 4294901760, %v223_v9 }
  0x1a   : > { %203 = vmatmul.f32.vlgmr.msra.gmra.mxu0 %v202_v8  ;;  %253 = vmatmul.f32.vlgmr.msra.gmra.mxu2 %v199_v3 }
  0x1b   : > { %299 = vmatpush.msrb.mxu0 %v224_v10  ;;  %v225_v11 = vsub.f32 %v223_v9, %v224_v10 }
  0x1d   : > { %v226_v12 = vand.u32 4294901760, %v225_v11 }
  0x1f   : > { %227 = vmatpush.msra.mxu1 %v226_v12 }
  0x20   : > { %229 = vmatmul.f32.vlgmr.msra.gmra.mxu1 %v198_v2 }
  0x21   : > { %321 = vmatpush.msrb.mxu1 %v196_v7 }
  0x22   : > { %301 = vmatmul.f32.vlgmr.msrb.gmra.mxu0 %v198_v2 }
  0x28   : > { %323 = vmatmul.f32.vlgmr.msrb.gmra.mxu1 %v198_v2 }
  0x97   : > { %v204_v13 = vpop.f32.mrf.mxu0 }
  0x9b   : > { %v278_v17 = vpop.f32.mrf.mxu3 }
  0x9d   : > { %v230_v14 = vpop.f32.mrf.mxu1  ;;  %v254_v15 = vpop.f32.mrf.mxu2 }
  0x9e   : > { %v231_v16 = vadd.f32 %v230_v14, %v204_v13 }
  0x9f   : > { %v302_v19 = vpop.f32.mrf.mxu0 }
  0xa0   : > { %v255_v18 = vadd.f32 %v254_v15, %v231_v16 }
  0xa2   : > { %v279_v20 = vadd.f32 %v278_v17, %v255_v18 }
  0xa4   : > { %v303_v21 = vadd.f32 %v302_v19, %v279_v20 }
  0xa5   : > { %v324_v22 = vpop.f32.mrf.mxu1 }
  0xa6   : > { %v325_v23 = vadd.f32 %v324_v22, %v303_v21 }
  0xa8   : > { %327 = vst [vmem:[%s174_s26] sm:$0xff] %v325_v23 }
  0xa9 PF: > { %s12_s13 = sadd.s32 1, %s502_s13   ;;  %s583_s9 = smov %s494_s11 }
  0xaa   : > { %p9_p7 = scmp.ge.s32.totalorder %s12_s13, 8   ;;  %s584_s10 = smov %s498_s12 }
  0xab   : > { %s585_s11 = smov %s588_s14  ;;  %s586_s12 = smov %s592_s15 }
  0xac   :  { %11 = sbr.rel (!%p9_p7) target bundleno = 3 (0x3), region = 58 }

</bundles_post_ra>
